<compile_context>
chip_gen: v6e
topology: v6e:2x2x1
jax: 0.10.0
libtpu: 0.0.40
codegen_flags: <defaults>
</compile_context>

<pallas_src>
import jax
import jax.numpy as jnp
from jax.experimental import pallas as pl
from jax.experimental.pallas import tpu as pltpu

IMAGE_SIZE = 28 * 28   # 784
HIDDEN0 = 100
HIDDEN1 = 50
NUMBER_OF_LABELS = 10

# lane-padded widths (MXU / store friendly)
H0_PAD = 128
H1_PAD = 128
OUT_PAD = 128
NEG_BIAS = -1e30  # padded logit columns -> exp underflows to 0 in log_softmax

MAX_TM = 2048     # rows per grid step (memory-bound: big tiles amortize step cost)


def _round_up(x, m):
    return ((x + m - 1) // m) * m


def mlp_kernel(x_ref, w0_ref, b0_ref, w1_ref, b1_ref, w2_ref, b2_ref, o_ref):
    x = x_ref[...]                                            # (TM, 784) bf16

    # fc0 + relu  (f32 accumulate on the MXU, bf16 activation for next matmul)
    h0 = jnp.dot(x, w0_ref[...], preferred_element_type=jnp.float32) + b0_ref[...]
    h0 = jnp.maximum(h0, 0.0).astype(jnp.bfloat16)            # (TM, 128)

    # fc1 + relu
    h1 = jnp.dot(h0, w1_ref[...], preferred_element_type=jnp.float32) + b1_ref[...]
    h1 = jnp.maximum(h1, 0.0).astype(jnp.bfloat16)            # (TM, 128)

    # fc2 (padded output columns carry bias = -1e30)
    logits = jnp.dot(h1, w2_ref[...], preferred_element_type=jnp.float32) + b2_ref[...]

    # log_softmax along the last axis, f32.  Padded columns are ~-1e30 so they
    # never win the max and exp(shifted) underflows to exactly 0.
    m = jnp.max(logits, axis=-1, keepdims=True)
    shifted = logits - m
    lse = jnp.log(jnp.sum(jnp.exp(shifted), axis=-1, keepdims=True))
    o_ref[...] = shifted - lse                                # (TM, 128) f32, lane-dense


def model_b_forward(x, params):
    """x: any shape that flattens to (N, 784). Returns (N, 10) log-probs (f32)."""
    w0, b0, w1, b1, w2, b2 = params
    xf = x.reshape(-1, IMAGE_SIZE)
    n = xf.shape[0]

    # batch tiling: TM rows per grid step (multiple of 8), pad N up to a multiple
    tm = min(MAX_TM, _round_up(max(n, 1), 8))
    n_pad = _round_up(n, tm)
    xf = jnp.pad(xf.astype(jnp.bfloat16), ((0, n_pad - n), (0, 0)))

    # lane-pad weights/biases; weights bf16, biases f32
    w0p = jnp.zeros((IMAGE_SIZE, H0_PAD), jnp.bfloat16).at[:, :HIDDEN0].set(
        w0.astype(jnp.bfloat16))
    b0p = jnp.zeros((1, H0_PAD), jnp.float32).at[:, :HIDDEN0].set(
        b0.reshape(1, -1).astype(jnp.float32))
    w1p = jnp.zeros((H0_PAD, H1_PAD), jnp.bfloat16).at[:HIDDEN0, :HIDDEN1].set(
        w1.astype(jnp.bfloat16))
    b1p = jnp.zeros((1, H1_PAD), jnp.float32).at[:, :HIDDEN1].set(
        b1.reshape(1, -1).astype(jnp.float32))
    w2p = jnp.zeros((H1_PAD, OUT_PAD), jnp.bfloat16).at[:HIDDEN1, :NUMBER_OF_LABELS].set(
        w2.astype(jnp.bfloat16))
    b2p = jnp.full((1, OUT_PAD), NEG_BIAS, jnp.float32).at[:, :NUMBER_OF_LABELS].set(
        b2.reshape(1, -1).astype(jnp.float32))

    resident = lambda shape: pl.BlockSpec(shape, lambda i: (0, 0))

    out = pl.pallas_call(
        mlp_kernel,
        out_shape=jax.ShapeDtypeStruct((n_pad, OUT_PAD), jnp.float32),
        grid_spec=pltpu.PrefetchScalarGridSpec(
            num_scalar_prefetch=0,
            grid=(n_pad // tm,),
            in_specs=[
                pl.BlockSpec((tm, IMAGE_SIZE), lambda i: (i, 0)),   # x tile streams
                resident((IMAGE_SIZE, H0_PAD)),                     # weights stay put
                resident((1, H0_PAD)),
                resident((H0_PAD, H1_PAD)),
                resident((1, H1_PAD)),
                resident((H1_PAD, OUT_PAD)),
                resident((1, OUT_PAD)),
            ],
            out_specs=pl.BlockSpec((tm, OUT_PAD), lambda i: (i, 0)),
        ),
        compiler_params=pltpu.CompilerParams(
            dimension_semantics=("parallel",),   # shard batch tiles across TCs (v7x)
            vmem_limit_bytes=32 << 20,
        ),
    )(xf, w0p, b0p, w1p, b1p, w2p, b2p)

    return out[:n, :NUMBER_OF_LABELS]


def init_params(key):
    """Deterministic init mimicking PyTorch nn.Linear default (U[-1/sqrt(fan_in), +])."""
    def linear(k, fan_in, fan_out):
        kw, kb = jax.random.split(k)
        bound = 1.0 / jnp.sqrt(fan_in)
        # stored as (in, out) so the kernel computes x @ W
        w = jax.random.uniform(kw, (fan_in, fan_out), jnp.float32, -bound, bound)
        b = jax.random.uniform(kb, (1, fan_out), jnp.float32, -bound, bound)
        return w, b

    k0, k1, k2 = jax.random.split(key, 3)
    w0, b0 = linear(k0, IMAGE_SIZE, HIDDEN0)
    w1, b1 = linear(k1, HIDDEN0, HIDDEN1)
    w2, b2 = linear(k2, HIDDEN1, NUMBER_OF_LABELS)
    return (w0, b0, w1, b1, w2, b2)


def _reference_forward(x, params):
    """Pure-JAX f32 reference of ModelB.forward."""
    w0, b0, w1, b1, w2, b2 = params
    xf = x.reshape(-1, IMAGE_SIZE).astype(jnp.float32)
    h0 = jnp.maximum(xf @ w0 + b0, 0.0)
    h1 = jnp.maximum(h0 @ w1 + b1, 0.0)
    logits = h1 @ w2 + b2
    return jax.nn.log_softmax(logits, axis=-1)


if __name__ == "__main__":
    key = jax.random.PRNGKey(0)
    kparam, kx = jax.random.split(key)

    params = init_params(kparam)

    # Small MNIST-like batch: (N, C, H, W) = (2, 1, 28, 28); forward flattens it.
    x = jax.random.normal(kx, (2, 1, 28, 28), jnp.float32)

    out = model_b_forward(x, params)
    out = jax.block_until_ready(out)

    assert out.shape == (2, NUMBER_OF_LABELS)
    # log_softmax rows must (approximately) exp-sum to 1
    row_sums = jnp.exp(out).sum(axis=1)
    assert bool(jnp.allclose(row_sums, 1.0, atol=1e-4))
    # compare against f32 reference (bf16 matmul inputs -> loose tolerance)
    ref = _reference_forward(x, params)
    assert bool(jnp.allclose(out, ref, atol=1e-1)), "mismatch vs f32 reference"

    print("KERNEL_OK")
</pallas_src>

<mosaic_0001>
module attributes {stable_mosaic.version = 11 : i64} {
  func.func @mlp_kernel(%arg0: i32, %arg1: memref<8x784xbf16, #tpu.memory_space<vmem>>, %arg2: memref<784x128xbf16, #tpu.memory_space<vmem>>, %arg3: memref<1x128xf32, #tpu.memory_space<vmem>>, %arg4: memref<128x128xbf16, #tpu.memory_space<vmem>>, %arg5: memref<1x128xf32, #tpu.memory_space<vmem>>, %arg6: memref<128x128xbf16, #tpu.memory_space<vmem>>, %arg7: memref<1x128xf32, #tpu.memory_space<vmem>>, %arg8: memref<8x128xf32, #tpu.memory_space<vmem>>) attributes {dimension_semantics = [#tpu.dimension_semantics<parallel>], iteration_bounds = array<i64: 1>, scalar_prefetch = 0 : i64, scratch_operands = 0 : i64, tpu.core_type = #tpu.core_type<tc>, window_params = [{transform_indices = @transform_0, window_bounds = array<i64: 8, 784>}, {pipeline_mode = #tpu.pipeline_mode<synchronous>, transform_indices = @transform_1, window_bounds = array<i64: 784, 128>}, {pipeline_mode = #tpu.pipeline_mode<synchronous>, transform_indices = @transform_2, window_bounds = array<i64: 1, 128>}, {pipeline_mode = #tpu.pipeline_mode<synchronous>, transform_indices = @transform_3, window_bounds = array<i64: 128, 128>}, {pipeline_mode = #tpu.pipeline_mode<synchronous>, transform_indices = @transform_4, window_bounds = array<i64: 1, 128>}, {pipeline_mode = #tpu.pipeline_mode<synchronous>, transform_indices = @transform_5, window_bounds = array<i64: 128, 128>}, {pipeline_mode = #tpu.pipeline_mode<synchronous>, transform_indices = @transform_6, window_bounds = array<i64: 1, 128>}, {transform_indices = @transform_7, window_bounds = array<i64: 8, 128>}]} {
    %c0 = arith.constant 0 : index
    %c0_0 = arith.constant 0 : index
    %0 = vector.load %arg1[%c0, %c0_0] : memref<8x784xbf16, #tpu.memory_space<vmem>>, vector<8x784xbf16>
    %c0_1 = arith.constant 0 : index
    %c0_2 = arith.constant 0 : index
    %1 = vector.load %arg2[%c0_1, %c0_2] : memref<784x128xbf16, #tpu.memory_space<vmem>>, vector<784x128xbf16>
    %cst = arith.constant dense<0.000000e+00> : vector<8x128xf32>
    %2 = tpu.matmul %0, %1, %cst {dimension_numbers = #tpu.dot_dimension_numbers<[1], [0], [0], [1], [0, 0, 1, 1], [], []>} : vector<8x784xbf16>, vector<784x128xbf16>, vector<8x128xf32> -> vector<8x128xf32>
    %c0_3 = arith.constant 0 : index
    %c0_4 = arith.constant 0 : index
    %3 = vector.load %arg3[%c0_3, %c0_4] : memref<1x128xf32, #tpu.memory_space<vmem>>, vector<1x128xf32>
    %4 = vector.broadcast %3 : vector<1x128xf32> to vector<8x128xf32>
    %5 = arith.addf %2, %4 : vector<8x128xf32>
    %cst_5 = arith.constant 0.000000e+00 : f32
    %6 = vector.broadcast %cst_5 : f32 to vector<8x128xf32>
    %7 = arith.maximumf %5, %6 : vector<8x128xf32>
    %8 = arith.truncf %7 : vector<8x128xf32> to vector<8x128xbf16>
    %c0_6 = arith.constant 0 : index
    %c0_7 = arith.constant 0 : index
    %9 = vector.load %arg4[%c0_6, %c0_7] : memref<128x128xbf16, #tpu.memory_space<vmem>>, vector<128x128xbf16>
    %cst_8 = arith.constant dense<0.000000e+00> : vector<8x128xf32>
    %10 = tpu.matmul %8, %9, %cst_8 {dimension_numbers = #tpu.dot_dimension_numbers<[1], [0], [0], [1], [0, 0, 1, 1], [], []>} : vector<8x128xbf16>, vector<128x128xbf16>, vector<8x128xf32> -> vector<8x128xf32>
    %c0_9 = arith.constant 0 : index
    %c0_10 = arith.constant 0 : index
    %11 = vector.load %arg5[%c0_9, %c0_10] : memref<1x128xf32, #tpu.memory_space<vmem>>, vector<1x128xf32>
    %12 = vector.broadcast %11 : vector<1x128xf32> to vector<8x128xf32>
    %13 = arith.addf %10, %12 : vector<8x128xf32>
    %cst_11 = arith.constant 0.000000e+00 : f32
    %14 = vector.broadcast %cst_11 : f32 to vector<8x128xf32>
    %15 = arith.maximumf %13, %14 : vector<8x128xf32>
    %16 = arith.truncf %15 : vector<8x128xf32> to vector<8x128xbf16>
    %c0_12 = arith.constant 0 : index
    %c0_13 = arith.constant 0 : index
    %17 = vector.load %arg6[%c0_12, %c0_13] : memref<128x128xbf16, #tpu.memory_space<vmem>>, vector<128x128xbf16>
    %cst_14 = arith.constant dense<0.000000e+00> : vector<8x128xf32>
    %18 = tpu.matmul %16, %17, %cst_14 {dimension_numbers = #tpu.dot_dimension_numbers<[1], [0], [0], [1], [0, 0, 1, 1], [], []>} : vector<8x128xbf16>, vector<128x128xbf16>, vector<8x128xf32> -> vector<8x128xf32>
    %c0_15 = arith.constant 0 : index
    %c0_16 = arith.constant 0 : index
    %19 = vector.load %arg7[%c0_15, %c0_16] : memref<1x128xf32, #tpu.memory_space<vmem>>, vector<1x128xf32>
    %20 = vector.broadcast %19 : vector<1x128xf32> to vector<8x128xf32>
    %21 = arith.addf %18, %20 : vector<8x128xf32>
    %cst_17 = arith.constant dense<0xFF800000> : vector<8xf32>
    %22 = vector.multi_reduction <maximumf>, %21, %cst_17 [1] : vector<8x128xf32> to vector<8xf32>
    %23 = vector.shape_cast %22 : vector<8xf32> to vector<8x1xf32>
    %24 = vector.broadcast %23 : vector<8x1xf32> to vector<8x128xf32>
    %25 = arith.subf %21, %24 : vector<8x128xf32>
    %26 = math.exp %25 : vector<8x128xf32>
    %cst_18 = arith.constant dense<0.000000e+00> : vector<8xf32>
    %27 = vector.multi_reduction <add>, %26, %cst_18 [1] : vector<8x128xf32> to vector<8xf32>
    %28 = vector.shape_cast %27 : vector<8xf32> to vector<8x1xf32>
    %29 = math.log %28 : vector<8x1xf32>
    %30 = vector.broadcast %29 : vector<8x1xf32> to vector<8x128xf32>
    %31 = arith.subf %25, %30 : vector<8x128xf32>
    %c0_19 = arith.constant 0 : index
    %c0_20 = arith.constant 0 : index
    %32 = vector.load %arg8[%c0_19, %c0_20] : memref<8x128xf32, #tpu.memory_space<vmem>>, vector<8x128xf32>
    tpu.vector_store %arg8[%c0_19, %c0_20], %31 {strides = array<i32>} : memref<8x128xf32, #tpu.memory_space<vmem>>, vector<8x128xf32>,
    return
  }
  func.func @transform_0(%arg0: i32) -> (i32, i32) {
    %c0_i32 = arith.constant 0 : i32
    %c0_i32_0 = arith.constant 0 : i32
    return %arg0, %c0_i32 : i32, i32
  }
  func.func @transform_1(%arg0: i32) -> (i32, i32) {
    %c0_i32 = arith.constant 0 : i32
    %c0_i32_0 = arith.constant 0 : i32
    %c0_i32_1 = arith.constant 0 : i32
    return %c0_i32, %c0_i32_0 : i32, i32
  }
  func.func @transform_2(%arg0: i32) -> (i32, i32) {
    %c0_i32 = arith.constant 0 : i32
    %c0_i32_0 = arith.constant 0 : i32
    %c0_i32_1 = arith.constant 0 : i32
    return %c0_i32, %c0_i32_0 : i32, i32
  }
  func.func @transform_3(%arg0: i32) -> (i32, i32) {
    %c0_i32 = arith.constant 0 : i32
    %c0_i32_0 = arith.constant 0 : i32
    %c0_i32_1 = arith.constant 0 : i32
    return %c0_i32, %c0_i32_0 : i32, i32
  }
  func.func @transform_4(%arg0: i32) -> (i32, i32) {
    %c0_i32 = arith.constant 0 : i32
    %c0_i32_0 = arith.constant 0 : i32
    %c0_i32_1 = arith.constant 0 : i32
    return %c0_i32, %c0_i32_0 : i32, i32
  }
  func.func @transform_5(%arg0: i32) -> (i32, i32) {
    %c0_i32 = arith.constant 0 : i32
    %c0_i32_0 = arith.constant 0 : i32
    %c0_i32_1 = arith.constant 0 : i32
    return %c0_i32, %c0_i32_0 : i32, i32
  }
  func.func @transform_6(%arg0: i32) -> (i32, i32) {
    %c0_i32 = arith.constant 0 : i32
    %c0_i32_0 = arith.constant 0 : i32
    %c0_i32_1 = arith.constant 0 : i32
    return %c0_i32, %c0_i32_0 : i32, i32
  }
  func.func @transform_7(%arg0: i32) -> (i32, i32) {
    %c0_i32 = arith.constant 0 : i32
    %c0_i32_0 = arith.constant 0 : i32
    return %arg0, %c0_i32 : i32, i32
  }
}

</mosaic_0001>

<bundles_post_ra>
// kernel: tpu_custom_call.1
= control target key start
LH: loop header
LB: loop body
LE: loop exit
PB: predicated region body
PF: predicated region fallthrough
CT: control target
= control target key end

     0   :  { %12 = vsyncpa [#allocation3], 0  ;;  %s1432_s0 = inlined_call_operand.hbm [shape: bf16[8,784], index: 0, kind: input, shape index: {}]   ;;  %s1433_s1 = inlined_call_operand.hbm [shape: bf16[784,128], index: 1, kind: input, shape index: {}]   ;;  %s1434_s2 = inlined_call_operand.vmem [shape: f32[1,128], index: 2, kind: input, shape index: {}]   ;;  %s1435_s3 = inlined_call_operand.hbm [shape: bf16[128,128], index: 3, kind: input, shape index: {}]   ;;  %s1436_s4 = inlined_call_operand.vmem [shape: f32[1,128], index: 4, kind: input, shape index: {}]   ;;  %s1437_s5 = inlined_call_operand.hbm [shape: bf16[128,128], index: 5, kind: input, shape index: {}]   ;;  %s1438_s6 = inlined_call_operand.vmem [shape: f32[1,128], index: 6, kind: input, shape index: {}]   ;;  %s1439_s7 = inlined_call_operand.hbm [shape: f32[8,128], index: 7, kind: output, shape index: {}]  }
   0x1   :  { %13 = vsyncpa [#allocation6], 0 }
   0x2   :  { %14 = vsyncpa [#allocation9], 0 }
   0x3   :  { %15 = vsyncpa [#allocation4], 0  ;;  %s1327_s24 = smov [#allocation5]  }
   0x4   :  { %s31_s25 = sshll.u32 %s1327_s24, 4  ;;  %s32_s25 = int_to_ptr.vmem [resolvable:$true] %s31_s25 }
   0x5   :  { %s1227_s26 = scalar_lea.vmem %s32_s25, 6272  ;;  %p1232_p1 = scmp.lt.s32.totalorder %s32_s25, %s32_s25 }
   0x6   :  { %p1228_p0 = scmp.ne.s32.totalorder %s32_s25, %s1227_s26  ;;  %p1233_p2 = scmp.lt.s32.totalorder %s1227_s26, %s1227_s26 }
   0x8   :  { %p1234_p3 = por %p1233_p2, %p1232_p1 }
   0xa   :  { %p1235_p4 = pnand %p1234_p3, %p1228_p0 }
   0xc   :  { %1238 = shalt.err (!%p1235_p4)
}
   0xd   :  { %s1328_s27 = smov 64   ;;  %s1329_s28 = smov 4  }
   0xe   :  { %37 = dma.hbm_to_vmem [thread:$0]  %s1433_s1, 6272, %s32_s25, [#allocation6], %s1328_s27, %s1328_s27, %s1329_s28  }
   0xf   :  { %s1330_s8 = smov [#allocation2]   ;;  %s1331_s10 = smov [#allocation7]  }
  0x10   :  { %s22_s9 = sshll.u32 %s1330_s8, 4  ;;  %s45_s11 = sshll.u32 %s1331_s10, 4  ;;  %s23_s9 = int_to_ptr.vmem [resolvable:$true] %s22_s9  ;;  %s46_s11 = int_to_ptr.vmem [resolvable:$true] %s45_s11 }
  0x11   :  { %s1247_s12 = scalar_lea.vmem %s23_s9, 448  ;;  %p1252_p6 = scmp.lt.s32.totalorder %s23_s9, %s23_s9 }
  0x12   :  { %p1248_p5 = scmp.ne.s32.totalorder %s23_s9, %s1247_s12  ;;  %p1253_p7 = scmp.lt.s32.totalorder %s1247_s12, %s1247_s12 }
  0x14   :  { %p1254_p8 = por %p1253_p7, %p1252_p6 }
  0x16   :  { %p1255_p9 = pnand %p1254_p8, %p1248_p5 }
  0x18   :  { %1258 = shalt.err (!%p1255_p9)
}
  0x19   :  { %25 = dma.hbm_to_vmem [thread:$0]  %s1432_s0, 448, %s23_s9, [#allocation3]  }
  0x1a   :  { %s1267_s15 = scalar_lea.vmem %s46_s11, 1024  ;;  %p1272_p11 = scmp.lt.s32.totalorder %s46_s11, %s46_s11 }
  0x1b   :  { %p1268_p10 = scmp.ne.s32.totalorder %s46_s11, %s1267_s15  ;;  %p1273_p12 = scmp.lt.s32.totalorder %s1267_s15, %s1267_s15 }
  0x1d   :  { %p1274_p13 = por %p1273_p12, %p1272_p11 }
  0x1f   :  { %p1275_p0 = pnand %p1274_p13, %p1268_p10 }
  0x21   :  { %1278 = shalt.err (!%p1275_p0)
}
  0x22   :  { %51 = dma.hbm_to_vmem [thread:$0]  %s1435_s3, 1024, %s46_s11, [#allocation6], %s1328_s27, %s1328_s27, %s1329_s28  }
  0x23   :  { %s1332_s17 = smov [#allocation8]  }
  0x24   :  { %s59_s18 = sshll.u32 %s1332_s17, 4  ;;  %s60_s18 = int_to_ptr.vmem [resolvable:$true] %s59_s18 }
  0x25   :  { %s1287_s19 = scalar_lea.vmem %s60_s18, 1024  ;;  %p1292_p2 = scmp.lt.s32.totalorder %s60_s18, %s60_s18 }
  0x26   :  { %p1288_p1 = scmp.ne.s32.totalorder %s60_s18, %s1287_s19  ;;  %p1293_p3 = scmp.lt.s32.totalorder %s1287_s19, %s1287_s19 }
  0x28   :  { %p1294_p4 = por %p1293_p3, %p1292_p2 }
  0x2a   :  { %p1295_p5 = pnand %p1294_p4, %p1288_p1 }
  0x2c   :  { %1298 = shalt.err (!%p1295_p5)
}
  0x2d   :  { %65 = dma.hbm_to_vmem [thread:$0]  %s1437_s5, 1024, %s60_s18, [#allocation9], %s1328_s27, %s1328_s27, %s1329_s28  }
  0x2e   :  { %1319 = dma.done.wait [#allocation3], 448  }
  0x2f   :  { %1320 = vsyncadd [#allocation3], 4294966848 }
  0x30   :  { %1321 = dma.done.wait [#allocation6], 7296  }
  0x31   :  { %1322 = vsyncadd [#allocation6], 4294960000 }
  0x32   :  { %1323 = dma.done.wait [#allocation9], 1024  }
  0x33   :  { %1324 = vsyncadd [#allocation9], 4294966272  ;;  %v1143_v0 = vld [vmem:[#allocation5 + $0x78] sm:$0xff]   ;;  %v1147_v4 = vld [vmem:[#allocation5 + $0x70] sm:$0xff]   ;;  %v1333_v43 = vmov 0.0   ;;  %vm1334_vm0 = vmmov 0  }
  0x34   :  { %v1144_v1 = vld [vmem:[#allocation5 + $0x38] sm:$0xff]   ;;  %1002 = vmatprep.subr.bf16.mxu0 %v1143_v0  ;;  %v1148_v5 = vld [vmem:[#allocation5 + $0x30] sm:$0xff]   ;;  %v1151_v8 = vld [vmem:[#allocation5 + $0x68] sm:$0xff]   ;;  %vm508_vm1 = vcmask 130048  }
  0x35   :  { %v1145_v2 = vld [vmem:[#allocation5 + $0xf8] sm:$0xff]   ;;  %1003 = vmatpush3.bf16.msra.mxu0 %v1144_v1  ;;  %v1149_v6 = vld [vmem:[#allocation5 + $0xf0] sm:$0xff]   ;;  %v1152_v9 = vld [vmem:[#allocation5 + $0x28] sm:$0xff]  }
  0x36   :  { %v1146_v3 = vld [vmem:[#allocation5 + $0xb8] sm:$0xff]   ;;  %1024 = vmatprep.subr.bf16.mxu1 %v1145_v2  ;;  %1004 = vmatprep.subr.bf16.mxu0 %v1147_v4  ;;  %v1150_v7 = vld [vmem:[#allocation5 + $0xb0] sm:$0xff]   ;;  %v1153_v10 = vld [vmem:[#allocation5 + $0xe8] sm:$0xff]  }
  0x37   :  { %1025 = vmatpush3.bf16.msra.mxu1 %v1146_v3  ;;  %v1154_v11 = vld [vmem:[#allocation5 + $0xa8] sm:$0xff]   ;;  %v1155_v12 = vld [vmem:[#allocation5 + $0x60] sm:$0xff]   ;;  %v1159_v16 = vld [vmem:[#allocation5 + $0x58] sm:$0xff]  }
  0x38   :  { %1026 = vmatprep.subr.bf16.mxu1 %v1149_v6  ;;  %v1156_v13 = vld [vmem:[#allocation5 + $0x20] sm:$0xff]   ;;  %v1160_v17 = vld [vmem:[#allocation5 + $0x18] sm:$0xff]   ;;  %v1163_v20 = vld [vmem:[#allocation5 + $0x50] sm:$0xff]  }
  0x39   :  { %1005 = vmatpush3.bf16.msra.mxu0 %v1148_v5  ;;  %v1157_v14 = vld [vmem:[#allocation5 + $0xe0] sm:$0xff]   ;;  %v1161_v18 = vld [vmem:[#allocation5 + $0xd8] sm:$0xff]   ;;  %v1164_v21 = vld [vmem:[#allocation5 + $0x10] sm:$0xff]  }
  0x3a   :  { %1006 = vmatprep.subr.bf16.mxu0 %v1151_v8  ;;  %v1158_v15 = vld [vmem:[#allocation5 + $0xa0] sm:$0xff]   ;;  %v1162_v19 = vld [vmem:[#allocation5 + $0x98] sm:$0xff]   ;;  %v1165_v22 = vld [vmem:[#allocation5 + $0xd0] sm:$0xff]  }
  0x3b   :  { %1027 = vmatpush3.bf16.msra.mxu1 %v1150_v7  ;;  %v1166_v23 = vld [vmem:[#allocation5 + $0x90] sm:$0xff]   ;;  %v1167_v24 = vld [vmem:[#allocation5 + $0x48] sm:$0xff]   ;;  %v1171_v28 = vld [vmem:[#allocation5 + $0x40] sm:$0xff]  }
  0x3c   :  { %1028 = vmatprep.subr.bf16.mxu1 %v1153_v10  ;;  %v1168_v25 = vld [vmem:[#allocation5 + $0x8] sm:$0xff]   ;;  %v1172_v29 = vld [vmem:[#allocation5] sm:$0xff]   ;;  %v1177_v35 = vld [vmem:[#allocation5 + $0x178] sm:$0xff]  }
  0x3d   :  { %1007 = vmatpush3.bf16.msra.mxu0 %v1152_v9  ;;  %v1169_v26 = vld [vmem:[#allocation5 + $0xc8] sm:$0xff]   ;;  %v1173_v30 = vld [vmem:[#allocation5 + $0xc0] sm:$0xff]   ;;  %v1180_v39 = vld [vmem:[#allocation5 + $0x138] sm:$0xff]  }
  0x3e   :  { %1008 = vmatprep.subr.bf16.mxu0 %v1155_v12  ;;  %v1170_v27 = vld [vmem:[#allocation5 + $0x88] sm:$0xff]   ;;  %v1176_v34 = vld [vmem:[#allocation5 + $0x80] sm:$0xff]   ;;  %v1181_v40 = vld [vmem:[#allocation5 + $0x170] sm:$0xff]  }
  0x3f   :  { %1029 = vmatpush3.bf16.msra.mxu1 %v1154_v11  ;;  %v81_v31 = vld [vmem:[#allocation2] sm:$0xff]  ;;  %v82_v36 = vld [vmem:[#allocation2 + $0x8] sm:$0xff]  ;;  %v1187_v47 = vld [vmem:[#allocation5 + $0x158] sm:$0xff]  }
  0x40   :  { %1030 = vmatprep.subr.bf16.mxu1 %v1157_v14  ;;  %v927_v32 = vcombine.low %v81_v31, %v81_v31  ;;  %v928_v33 = vcombine.high %v81_v31, %v81_v31  ;;  %v929_v37 = vcombine.low %v82_v36, %v82_v36  ;;  %v930_v38 = vcombine.high %v82_v36, %v82_v36  ;;  %v1182_v41 = vld [vmem:[#allocation5 + $0x130] sm:$0xff]   ;;  %v1183_v42 = vld [vmem:[#allocation5 + $0x168] sm:$0xff]   ;;  %v1185_v45 = vld [vmem:[#allocation5 + $0x160] sm:$0xff]  }
  0x41   :  { %1009 = vmatpush3.bf16.msra.mxu0 %v1156_v13  ;;  %v1184_v44 = vld [vmem:[#allocation5 + $0x128] sm:$0xff]   ;;  %v1186_v46 = vld [vmem:[#allocation5 + $0x120] sm:$0xff]   ;;  %v1188_v48 = vld [vmem:[#allocation5 + $0x118] sm:$0xff]  }
  0x42   :  { %1010 = vmatprep.subr.bf16.mxu0 %v1159_v16  ;;  %544 = vmatprep.mubr.bf16.mxu0 %v928_v33  ;;  %v1189_v49 = vld [vmem:[#allocation5 + $0x150] sm:$0xff]   ;;  %v1195_v50 = vld [vmem:[#allocation5 + $0x180] sm:$0xff]   ;;  %v1198_v54 = vld [vmem:[#allocation2 + $0x18] ss:$0 sps:$4 sm:$0xff]  }
  0x43   :  { %1031 = vmatpush3.bf16.msra.mxu1 %v1158_v15  ;;  %584 = vmatprep.mubr.bf16.mxu1 %v930_v38  ;;  %v83_v51 = vld [vmem:[#allocation2 + $0x10] sm:$0xff]  ;;  %v1191_v55 = vld [vmem:[#allocation5 + $0x148] sm:$0xff]   ;;  %v1193_v57 = vld [vmem:[#allocation5 + $0x140] sm:$0xff]  }
  0x44   :  { %1032 = vmatprep.subr.bf16.mxu1 %v1161_v18  ;;  %v1190_v52 = vld [vmem:[#allocation5 + $0x110] sm:$0xff]   ;;  %v932_v53 = vcombine.high %v83_v51, %v83_v51  ;;  %v1192_v56 = vld [vmem:[#allocation5 + $0x108] sm:$0xff]   ;;  %v1194_v58 = vld [vmem:[#allocation5 + $0x100] sm:$0xff]   ;;  %v931_v59 = vcombine.low %v83_v51, %v83_v51 }
  0x45   :  { %1011 = vmatpush3.bf16.msra.mxu0 %v1160_v17  ;;  %v1199_v60 = vld [vmem:[#allocation7 + $0x38] sm:$0xff]   ;;  %v1200_v61 = vld [vmem:[#allocation7 + $0x30] sm:$0xff]   ;;  %v1201_v62 = vld [vmem:[#allocation7 + $0x28] sm:$0xff]  }
  0x46   :  { %1012 = vmatprep.subr.bf16.mxu0 %v1163_v20  ;;  %v1202_v63 = vld [vmem:[#allocation7 + $0x20] sm:$0xff]   ;;  %v1203_v0 = vld [vmem:[#allocation7 + $0x18] sm:$0xff]   ;;  %v1204_v1 = vld [vmem:[#allocation7 + $0x10] sm:$0xff]  }
  0x47   :  { %1033 = vmatpush3.bf16.msra.mxu1 %v1162_v19  ;;  %v1205_v2 = vld [vmem:[#allocation7 + $0x8] sm:$0xff]   ;;  %v1206_v3 = vld [vmem:[#allocation7] sm:$0xff]   ;;  %v1207_v4 = vld [vmem:[#allocation8 + $0x38] sm:$0xff]  }
  0x48   :  { %1034 = vmatprep.subr.bf16.mxu1 %v1165_v22  ;;  %v1208_v5 = vld [vmem:[#allocation8 + $0x30] sm:$0xff]   ;;  %v1209_v6 = vld [vmem:[#allocation8 + $0x28] sm:$0xff]   ;;  %v1210_v7 = vld [vmem:[#allocation8 + $0x20] sm:$0xff]  }
  0x49   :  { %1013 = vmatpush3.bf16.msra.mxu0 %v1164_v21  ;;  %v1211_v8 = vld [vmem:[#allocation8 + $0x18] sm:$0xff]   ;;  %v1212_v9 = vld [vmem:[#allocation8 + $0x10] sm:$0xff]   ;;  %v1213_v36 = vld [vmem:[#allocation8 + $0x8] sm:$0xff]  }
  0x4a   :  { %1014 = vmatprep.subr.bf16.mxu0 %v1167_v24  ;;  %v984_v38 = vld [vmem:[%s1436_s4] ss:$0 sm:$0xff]  ;;  %s1335_s4 = smov [#allocation10]  }
  0x4b   :  { %1035 = vmatpush3.bf16.msra.mxu1 %v1166_v23  ;;  %v926_v23 = vld [vmem:[%s1434_s2] ss:$0 sm:$0xff]  ;;  %s915_s24 = sshll.u32 %s1335_s4, 4  ;;  %s916_s24 = int_to_ptr.vmem [resolvable:$true] %s915_s24 }
  0x4c   :  { %1036 = vmatprep.subr.bf16.mxu1 %v1169_v26  ;;  %p1304_p7 = scmp.lt.s32.totalorder %s916_s24, %s916_s24 }
  0x4d   :  { %1015 = vmatpush3.bf16.msra.mxu0 %v1168_v25 }
  0x4e   :  { %1016 = vmatprep.subr.bf16.mxu0 %v1171_v28 }
  0x4f   :  { %1037 = vmatpush3.bf16.msra.mxu1 %v1170_v27 }
  0x50   :  { %1038 = vmatprep.subr.bf16.mxu1 %v1173_v30 }
  0x51   :  { %1017 = vmatpush3.bf16.msra.mxu0 %v1172_v29 }
  0x52   :  { %1046 = vmatprep.subr.bf16.mxu0 %v1177_v35 }
  0x53   :  { %1039 = vmatpush3.bf16.msra.mxu1 %v1176_v34 }
  0x54   :  { %545 = vmatmul.mubr.bf16.vlgmr.msra.gmra.mxu0 %v927_v32  ;;  %1088 = vmatprep.subr.bf16.mxu1 %v1333_v43 }
  0x55   :  { %1047 = vmatpush3.bf16.msra.mxu0 %v1180_v39  ;;  %624 = vmatprep.mubr.bf16.mxu0 %v932_v53 }
  0x56   :  { %585 = vmatmul.mubr.bf16.vlgmr.msra.gmra.mxu1 %v929_v37  ;;  %1048 = vmatprep.subr.bf16.mxu0 %v1181_v40  ;;  %v1214_v37 = vld [vmem:[#allocation8] sm:$0xff]  }
  0x57   :  { %1090 = vmatprep.mubr.msk.bf16.mxu1 %vm1334_vm0, %v1333_v43  ;;  %1089 = vmatpush3.bf16.msra.mxu1 %v1195_v50 }
  0x58   :  { %1094 = vmatprep.subr.bf16.mxu1 %v1333_v43 }
  0x59   :  { %1049 = vmatpush3.bf16.msra.mxu0 %v1182_v41 }
  0x5a   :  { %1050 = vmatprep.subr.bf16.mxu0 %v1183_v42 }
  0x5d   :  { %1051 = vmatpush3.bf16.msra.mxu0 %v1184_v44 }
  0x5e   :  { %1052 = vmatprep.subr.bf16.mxu0 %v1185_v45  ;;  %1091 = vmatmul.mubr.msk.bf16.vlgmr.msra.gmra.mxu1 %vm508_vm1, %v1198_v54 }
  0x5f   :  { %1110 = vmatprep.mubr.msk.bf16.mxu1 %vm1334_vm0, %v1333_v43  ;;  %1095 = vmatpush3.bf16.msra.mxu1 %v1199_v60 }
  0x60   :  { %1096 = vmatprep.subr.bf16.mxu1 %v1333_v43 }
  0x61   :  { %1053 = vmatpush3.bf16.msra.mxu0 %v1186_v46 }
  0x62   :  { %1054 = vmatprep.subr.bf16.mxu0 %v1187_v47  ;;  %v993_v47 = vld [vmem:[%s1438_s6] ss:$0 sm:$0xff]  ;;  %s1299_s6 = scalar_lea.vmem %s916_s24, 128 }
  0x63   :  { %1097 = vmatpush3.bf16.msra.mxu1 %v1200_v61  ;;  %p1300_p6 = scmp.ne.s32.totalorder %s916_s24, %s1299_s6  ;;  %p1305_p8 = scmp.lt.s32.totalorder %s1299_s6, %s1299_s6 }
  0x64   :  { %1098 = vmatprep.subr.bf16.mxu1 %v1333_v43 }
  0x65   :  { %1055 = vmatpush3.bf16.msra.mxu0 %v1188_v48  ;;  %p1306_p9 = por %p1305_p8, %p1304_p7 }
  0x66   :  { %1056 = vmatprep.subr.bf16.mxu0 %v1189_v49 }
  0x67   :  { %1099 = vmatpush3.bf16.msra.mxu1 %v1201_v62  ;;  %p1307_p10 = pnand %p1306_p9, %p1300_p6 }
  0x68   :  { %1100 = vmatprep.subr.bf16.mxu1 %v1333_v43 }
  0x69   :  { %1057 = vmatpush3.bf16.msra.mxu0 %v1190_v52 }
  0x6a   :  { %1058 = vmatprep.subr.bf16.mxu0 %v1191_v55 }
  0x6b   :  { %1101 = vmatpush3.bf16.msra.mxu1 %v1202_v63 }
  0x6c   :  { %1102 = vmatprep.subr.bf16.mxu1 %v1333_v43 }
  0x6d   :  { %1059 = vmatpush3.bf16.msra.mxu0 %v1192_v56 }
  0x6e   :  { %1060 = vmatprep.subr.bf16.mxu0 %v1193_v57 }
  0x6f   :  { %1103 = vmatpush3.bf16.msra.mxu1 %v1203_v0 }
  0x70   :  { %1104 = vmatprep.subr.bf16.mxu1 %v1333_v43 }
  0x71   :  { %1061 = vmatpush3.bf16.msra.mxu0 %v1194_v58 }
  0x72   :  { %1114 = vmatprep.subr.bf16.mxu0 %v1333_v43 }
  0x73   :  { %1105 = vmatpush3.bf16.msra.mxu1 %v1204_v1 }
  0x74   :  { %625 = vmatmul.mubr.bf16.vlgmr.msra.gmra.mxu0 %v931_v59  ;;  %1106 = vmatprep.subr.bf16.mxu1 %v1333_v43 }
  0x75   :  { %1130 = vmatprep.mubr.msk.bf16.mxu0 %vm1334_vm0, %v1333_v43  ;;  %1115 = vmatpush3.bf16.msra.mxu0 %v1207_v4 }
  0x76   :  { %1116 = vmatprep.subr.bf16.mxu0 %v1333_v43 }
  0x77   :  { %1107 = vmatpush3.bf16.msra.mxu1 %v1205_v2 }
  0x78   :  { %1108 = vmatprep.subr.bf16.mxu1 %v1333_v43 }
  0x79   :  { %1117 = vmatpush3.bf16.msra.mxu0 %v1208_v5 }
  0x7a   :  { %1118 = vmatprep.subr.bf16.mxu0 %v1333_v43 }
  0x7b   :  { %1109 = vmatpush3.bf16.msra.mxu1 %v1206_v3 }
  0x7d   :  { %1119 = vmatpush3.bf16.msra.mxu0 %v1209_v6 }
  0x7e   :  { %1120 = vmatprep.subr.bf16.mxu0 %v1333_v43 }
  0x81   :  { %1121 = vmatpush3.bf16.msra.mxu0 %v1210_v7 }
  0x82   :  { %1122 = vmatprep.subr.bf16.mxu0 %v1333_v43 }
  0x85   :  { %1123 = vmatpush3.bf16.msra.mxu0 %v1211_v8 }
  0x86   :  { %1124 = vmatprep.subr.bf16.mxu0 %v1333_v43 }
  0x89   :  { %1125 = vmatpush3.bf16.msra.mxu0 %v1212_v9 }
  0x8a   :  { %1126 = vmatprep.subr.bf16.mxu0 %v1333_v43 }
  0x8d   :  { %1127 = vmatpush3.bf16.msra.mxu0 %v1213_v36 }
  0x8e   :  { %1128 = vmatprep.subr.bf16.mxu0 %v1333_v43 }
  0x91   :  { %1129 = vmatpush3.bf16.msra.mxu0 %v1214_v37 }
 0x114   :  { %v1018_v10 = vpop.f32.mrf.mxu0 }
 0x116   :  { %v1019_v11 = vpop.f32.mrf.mxu0  ;;  %v1040_v12 = vpop.f32.mrf.mxu1 }
 0x117   :  { %v1020_v22 = vadd.f32 %v1019_v11, %v1018_v10 }
 0x118   :  { %v1021_v13 = vpop.f32.mrf.mxu0  ;;  %v1041_v14 = vpop.f32.mrf.mxu1 }
 0x119   :  { %v547_v24 = vadd.f32 %v1020_v22, %v926_v23  ;;  %v1042_v25 = vadd.f32 %v1041_v14, %v1040_v12 }
 0x11a   :  { %v1022_v15 = vpop.f32.mrf.mxu0  ;;  %v1043_v16 = vpop.f32.mrf.mxu1 }
 0x11b   :  { %v587_v28 = vadd.f32 %v1042_v25, %v547_v24 }
 0x11c   :  { %v1044_v17 = vpop.f32.mrf.mxu1 }
 0x11e   :  { %v666_v18 = vpop.f32.mrf.mxu1 }
 0x120   :  { %v1092_v19 = vpop.f32.mrf.mxu1 }
 0x122   :  { %v669_v20 = vpop.f32.mrf.mxu1 }
 0x124   :  { %v1093_v21 = vpop.f32.mrf.mxu1 }
 0x134   :  { %v1062_v26 = vpop.f32.mrf.mxu0 }
 0x136   :  { %v1063_v27 = vpop.f32.mrf.mxu0 }
 0x137   :  { %v1064_v29 = vadd.f32 %v1063_v27, %v1062_v26 }
 0x138   :  { %v1065_v30 = vpop.f32.mrf.mxu0 }
 0x139   :  { %v627_v31 = vadd.f32 %v1064_v29, %v587_v28 }
 0x13a   :  { %v1066_v32 = vpop.f32.mrf.mxu0 }
 0x13b   :  { %v667_v33 = vadd.f32 %v666_v18, %v627_v31 }
 0x13d   :  { %v672_v34 = vmax.f32 %v667_v33, 0.0 }
 0x13f   :  { %v673_v35 = vpack.c.bf16 %v672_v34, %v672_v34 }
 0x141   :  { %1111 = vmatmul.mubr.bf16.vlgmr.msra.gmra.mxu1 %v673_v35 }
 0x201   :  { %v779_v39 = vpop.f32.mrf.mxu1 }
 0x202   :  { %v780_v40 = vadd.f32 %v984_v38, %v779_v39 }
 0x203   :  { %v1112_v41 = vpop.f32.mrf.mxu1 }
 0x204   :  { %v785_v42 = vmax.f32 %v780_v40, 0.0 }
 0x205   :  { %v782_v44 = vpop.f32.mrf.mxu1 }
 0x206   :  { %v786_v45 = vpack.c.bf16 %v785_v42, %v785_v42 }
 0x207   :  { %v1113_v46 = vpop.f32.mrf.mxu1 }
 0x208   :  { %1131 = vmatmul.mubr.bf16.vlgmr.msra.gmra.mxu0 %v786_v45 }
 0x2c8   :  { %v892_v48 = vpop.f32.mrf.mxu0 }
 0x2c9   :  { %v893_v43 = vadd.f32 %v993_v47, %v892_v48 }
 0x2ca   :  { %v1132_v49 = vpop.f32.mrf.mxu0 }
 0x2cb   :  { %898 = vmax.xlane.f32.xlu0 %v893_v43 }
 0x2cc   :  { %v895_v50 = vpop.f32.mrf.mxu0 }
 0x2ce   :  { %v1133_v51 = vpop.f32.mrf.mxu0 }
 0x354   :  { %v899_v52 = vpop.xlane.xlu0 %898 }
 0x355   :  { %v900_v53 = vsub.f32 %v893_v43, %v899_v52 }
 0x357   :  { %v901_v54 = vmul.f32 1.442695, %v900_v53 }
 0x359   :  { %1215 = vpow2.f32 %v901_v54 }
 0x366   :  { %v1216_v55 = vpop.eup %1215 }
 0x367   :  { %903 = vadd.xlane.f32.xlu0 %v1216_v55 }
 0x3f0   :  { %v904_v56 = vpop.xlane.xlu0 %903 }
 0x3f1   :  { %1217 = vlog2.f32 %v904_v56 }
 0x3fe   :  { %v1218_v57 = vpop.eup %1217 }
 0x3ff   :  { %v906_v58 = vmul.f32 0.6931472, %v1218_v57 }
 0x401   :  { %v907_v59 = vsub.f32 %v900_v53, %v906_v58 }
 0x403   :  { %908 = vst [vmem:[#allocation10] sm:$0xff] %v907_v59 }
 0x404   :  { %1310 = shalt.err (!%p1307_p10)
}
 0x405   :  { %918 = dma.vmem_to_hbm [thread:$0]  %s916_s24, 128, %s1439_s7, [#allocation4]  }
 0x406   :  { %1325 = dma.done.wait [#allocation4], 128  }
 0x407   :  { %1326 = vsyncadd [#allocation4], 4294967168 }
 0x408   :  { %922 = vsyncpa [#allocation3], 1 }
 0x409   :  { %923 = vsyncpa [#allocation6], 1 }
 0x40a   :  { %924 = vsyncpa [#allocation9], 1 }
 0x40b   :  { %925 = vsyncpa [#allocation4], 1 }

</bundles_post_ra>
